<compile_context>
chip_gen: v7x
topology: tpu7x:2x2x1
jax: 0.10.0
libtpu: 0.0.40
codegen_flags: <defaults>
</compile_context>

<pallas_src>
import jax
import jax.numpy as jnp
from jax import lax
from jax.experimental import pallas as pl
from jax.experimental.pallas import tpu as pltpu

_LANES = 128
_NT_DIMS = (((1,), (1,)), ((), ()))   # contract the last dim of both operands


def _round_up(a, b):
    return ((a + b - 1) // b) * b


def _logreg_kernel(x_ref, w_ref, b_ref, o_ref):
    # x_ref: (TMP, FP)    -- P samples packed per 128-lane row (row-major)
    # w_ref: (P, FP)      -- row c carries W in lanes [c*F, (c+1)*F), else 0
    # b_ref: (1,)  f32    -- bias, in SMEM
    # o_ref: (P, TMP) f32 -- lane-dense output; sample r*P + c lands at [c, r]
    z = lax.dot_general(w_ref[...], x_ref[...], _NT_DIMS,
                        preferred_element_type=jnp.float32)
    z = z + b_ref[0]
    # Exact, numerically stable sigmoid: the kernel is HBM-bandwidth bound,
    # so exp (EUP) + divide are free slack; no approx reciprocal.
    ez = jnp.exp(-jnp.abs(z))                      # in (0, 1]
    o_ref[...] = jnp.where(z >= 0.0, 1.0 / (1.0 + ez), ez / (1.0 + ez))


def logistic_regression_forward(x, weight, bias, *, block_rows=8192):
    """sigmoid(x @ weight.T + bias) as a tiled, HBM-bound Pallas TPU kernel.

    x:      (N, F) float32 / bfloat16 (other dtypes cast to float32, mirroring
            the module's .float())
    weight: (1, F)  (PyTorch nn.Linear weight layout)
    bias:   (1,)
    block_rows: packed rows per grid step (a packed row holds 128//F samples
            when F divides 128).  8192 rows = 4 MiB per f32 block.
    returns (N, 1) float32
    """
    x = jnp.asarray(x)
    if x.dtype != jnp.bfloat16:         # keep bf16 inputs bf16 (2x less HBM read)
        x = x.astype(jnp.float32)
    cdt = x.dtype

    w = jnp.asarray(weight, cdt).reshape(-1)        # (F,)
    b = jnp.asarray(bias, jnp.float32).reshape(1)   # (1,)

    n, f = x.shape

    # Lane packing: P samples per 128-lane row when F divides 128.
    p = _LANES // f if (f <= _LANES and _LANES % f == 0) else 1
    fp = p * f

    # Pad the sample count only to a multiple of P (<= P-1 rows): no full copy
    # of x in the common case; the reshape below is a free row-major relabel.
    n_rows = -(-n // p)
    n_pack = n_rows * p
    if n_pack != n:
        x = jnp.pad(x, ((0, n_pack - n), (0, 0)))
    xp = x.reshape(n_rows, fp)

    # Transposed block-diagonal weight: row c carries W in lanes [c*F,(c+1)*F).
    # Contracting the lane axis of both operands yields a (P, TMP) output tile
    # that is lane-dense along the (large) sample axis.
    w_t = jnp.kron(jnp.eye(p, dtype=cdt), w.reshape(1, f))        # (P, FP)

    # Block-size selection:
    #  * small inputs -> one (possibly unaligned) full-array block;
    #  * otherwise 128-row-aligned blocks, capped at block_rows, targeted so
    #    the grid has >= 2 steps (both v7x TensorCores get work).  The ragged
    #    trailing block is read-padded / write-masked by Pallas; its garbage
    #    rows only affect output columns the wrapper discards.
    if n_rows <= block_rows and n_rows <= 1024:
        tmp = n_rows
    else:
        half = -(-n_rows // 2)
        tmp = min(block_rows, _round_up(half, _LANES))
        tmp = max(_LANES, (tmp // _LANES) * _LANES)
    steps = -(-n_rows // tmp)

    # Explicit VMEM budget: double-buffered input/output blocks + margin, kept
    # within every generation's default scoped limit (>= 16 MiB).
    itemsize = jnp.dtype(cdt).itemsize
    in_blk = _round_up(tmp, 16) * fp * itemsize
    out_blk = _round_up(p, 8) * _round_up(tmp, _LANES) * 4
    w_blk = _round_up(p, 8) * _round_up(fp, _LANES) * itemsize
    vmem_limit = int(min(max(2 * (in_blk + out_blk + w_blk) + (4 << 20),
                             16 << 20), 48 << 20))

    out = pl.pallas_call(
        _logreg_kernel,
        out_shape=jax.ShapeDtypeStruct((p, n_rows), jnp.float32),
        grid=(steps,),
        in_specs=[
            pl.BlockSpec((tmp, fp), lambda i: (i, 0)),
            pl.BlockSpec((p, fp), lambda i: (0, 0)),
            pl.BlockSpec(memory_space=pltpu.MemorySpace.SMEM),
        ],
        out_specs=pl.BlockSpec((p, tmp), lambda i: (0, i)),
        compiler_params=pltpu.CompilerParams(
            dimension_semantics=("parallel",),
            vmem_limit_bytes=vmem_limit),
    )(xp, w_t, b)

    # (P, n_rows) -> (N, 1): sample r*P + c sits at out[c, r]; padded tail
    # samples are discarded.
    return out.T.reshape(n_pack, 1)[:n]


if __name__ == "__main__":
    num_param = 32   # number of features

    key = jax.random.PRNGKey(0)
    kx1, kx2, kw, kb = jax.random.split(key, 4)

    # Deterministic init mimicking nn.Linear(num_param, 1):
    # uniform(-1/sqrt(F), 1/sqrt(F)) for both weight and bias.
    bound = 1.0 / jnp.sqrt(jnp.float32(num_param))
    weight = jax.random.uniform(kw, (1, num_param), jnp.float32, -bound, bound)
    bias = jax.random.uniform(kb, (1,), jnp.float32, -bound, bound)

    def reference(xv):
        z = jnp.einsum("nf,gf->ng", xv, weight, precision="highest") + bias
        return jax.nn.sigmoid(z)

    # Case 1: small batch -> single grid step, full-array blocks.
    x_small = jax.random.normal(kx1, (64, num_param), jnp.float32)
    out_small = jax.block_until_ready(
        logistic_regression_forward(x_small, weight, bias))
    assert out_small.shape == (64, 1)
    assert jnp.allclose(out_small, reference(x_small), atol=2e-3), "mismatch (small)"

    # Case 2: batch not a multiple of the packing factor + small block_rows ->
    # multi-step grid with a ragged trailing block; padding/garbage discarded.
    x_big = jax.random.normal(kx2, (523, num_param), jnp.float32)
    out_big = jax.block_until_ready(
        logistic_regression_forward(x_big, weight, bias, block_rows=128))
    assert out_big.shape == (523, 1)
    assert jnp.allclose(out_big, reference(x_big), atol=2e-3), "mismatch (big)"

    print("KERNEL_OK")
</pallas_src>

<mosaic_0001>
module attributes {stable_mosaic.version = 11 : i64} {
  func.func @_logreg_kernel(%arg0: i32, %arg1: memref<16x128xf32, #tpu.memory_space<vmem>>, %arg2: memref<4x128xf32, #tpu.memory_space<vmem>>, %arg3: memref<1xf32, #tpu.memory_space<smem>>, %arg4: memref<4x16xf32, #tpu.memory_space<vmem>>) attributes {dimension_semantics = [#tpu.dimension_semantics<parallel>], iteration_bounds = array<i64: 1>, scalar_prefetch = 0 : i64, scratch_operands = 0 : i64, tpu.core_type = #tpu.core_type<tc>, window_params = [{transform_indices = @transform_0, window_bounds = array<i64: 16, 128>}, {pipeline_mode = #tpu.pipeline_mode<synchronous>, transform_indices = @transform_1, window_bounds = array<i64: 4, 128>}, {transform_indices = @transform_2, window_bounds = array<i64: 1>}, {transform_indices = @transform_3, window_bounds = array<i64: 4, 16>}]} {
    %c0 = arith.constant 0 : index
    %c0_0 = arith.constant 0 : index
    %0 = vector.load %arg2[%c0, %c0_0] : memref<4x128xf32, #tpu.memory_space<vmem>>, vector<4x128xf32>
    %c0_1 = arith.constant 0 : index
    %c0_2 = arith.constant 0 : index
    %1 = vector.load %arg1[%c0_1, %c0_2] : memref<16x128xf32, #tpu.memory_space<vmem>>, vector<16x128xf32>
    %cst = arith.constant dense<0.000000e+00> : vector<4x16xf32>
    %2 = tpu.matmul %0, %1, %cst {dimension_numbers = #tpu.dot_dimension_numbers<[1], [1], [0], [0], [0, 0, 1, 0], [], []>} : vector<4x128xf32>, vector<16x128xf32>, vector<4x16xf32> -> vector<4x16xf32>
    %c0_3 = arith.constant 0 : index
    %3 = memref.load %arg3[%c0_3] : memref<1xf32, #tpu.memory_space<smem>>
    %4 = vector.broadcast %3 : f32 to vector<4x16xf32>
    %5 = arith.addf %2, %4 : vector<4x16xf32>
    %6 = math.absf %5 : vector<4x16xf32>
    %cst_4 = arith.constant 0.000000e+00 : f32
    %7 = vector.broadcast %cst_4 : f32 to vector<4x16xf32>
    %8 = arith.subf %7, %6 : vector<4x16xf32>
    %9 = math.exp %8 : vector<4x16xf32>
    %cst_5 = arith.constant 0.000000e+00 : f32
    %10 = vector.broadcast %cst_5 : f32 to vector<4x16xf32>
    %11 = arith.cmpf oge, %5, %10 : vector<4x16xf32>
    %cst_6 = arith.constant 1.000000e+00 : f32
    %12 = vector.broadcast %cst_6 : f32 to vector<4x16xf32>
    %13 = arith.addf %12, %9 : vector<4x16xf32>
    %cst_7 = arith.constant 1.000000e+00 : f32
    %14 = vector.broadcast %cst_7 : f32 to vector<4x16xf32>
    %15 = arith.divf %14, %13 : vector<4x16xf32>
    %cst_8 = arith.constant 1.000000e+00 : f32
    %16 = vector.broadcast %cst_8 : f32 to vector<4x16xf32>
    %17 = arith.addf %16, %9 : vector<4x16xf32>
    %18 = arith.divf %9, %17 : vector<4x16xf32>
    %19 = arith.select %11, %15, %18 : vector<4x16xi1>, vector<4x16xf32>
    %c0_9 = arith.constant 0 : index
    %c0_10 = arith.constant 0 : index
    %20 = vector.load %arg4[%c0_9, %c0_10] : memref<4x16xf32, #tpu.memory_space<vmem>>, vector<4x16xf32>
    tpu.vector_store %arg4[%c0_9, %c0_10], %19 {strides = array<i32>} : memref<4x16xf32, #tpu.memory_space<vmem>>, vector<4x16xf32>,
    return
  }
  func.func @transform_0(%arg0: i32) -> (i32, i32) {
    %c0_i32 = arith.constant 0 : i32
    %c0_i32_0 = arith.constant 0 : i32
    return %arg0, %c0_i32 : i32, i32
  }
  func.func @transform_1(%arg0: i32) -> (i32, i32) {
    %c0_i32 = arith.constant 0 : i32
    %c0_i32_0 = arith.constant 0 : i32
    %c0_i32_1 = arith.constant 0 : i32
    return %c0_i32, %c0_i32_0 : i32, i32
  }
  func.func @transform_2(%arg0: i32) -> i32 {
    %c0_i32 = arith.constant 0 : i32
    %c0_i32_0 = arith.constant 0 : i32
    return %c0_i32 : i32
  }
  func.func @transform_3(%arg0: i32) -> (i32, i32) {
    %c0_i32 = arith.constant 0 : i32
    %c0_i32_0 = arith.constant 0 : i32
    return %c0_i32, %arg0 : i32, i32
  }
}

</mosaic_0001>

<bundles_post_ra>
// kernel: tpu_custom_call.1
= control target key start
LH: loop header
LB: loop body
LE: loop exit
PB: predicated region body
PF: predicated region fallthrough
CT: control target
= control target key end

     0   :  { %9 = vsyncpa [#allocation4], 0  ;;  %s261_s0 = inlined_call_operand.hbm [shape: f32[16,128], index: 0, kind: input, shape index: {}]   ;;  %s262_s1 = inlined_call_operand.vmem [shape: f32[4,128], index: 1, kind: input, shape index: {}]   ;;  %s263_s2 = inlined_call_operand.<no memory space> [shape: f32[1], index: 2, kind: input, shape index: {}]   ;;  %s264_s3 = inlined_call_operand.hbm [shape: f32[4,16], index: 3, kind: output, shape index: {}]  }
   0x1   :  { %10 = vsyncpa [#allocation5], 0  ;;  %s204_s12 = smov [#allocation3]   ;;  %s156_s16 = scalar_lea.hbm %s261_s0, 256 }
   0x2   :  { %s16_s13 = sshll.u32 %s204_s12, 4  ;;  %p157_p0 = scmp.ne.s32.totalorder %s261_s0, %s156_s16  ;;  %s17_s13 = int_to_ptr.vmem [resolvable:$true] %s16_s13 }
   0x3   :  { %p160_p1 = scmp.lt.u32.totalorder %s156_s16, %s261_s0 }
   0x5   :  { %p162_p2 = pnand %p160_p1, %p157_p0 }
   0x7   :  { %165 = shalt.err (!%p162_p2)
}
   0x8   :  { %s166_s21 = scalar_lea.vmem %s17_s13, 256  ;;  %p171_p4 = scmp.lt.s32.totalorder %s17_s13, %s17_s13 }
   0x9   :  { %p167_p3 = scmp.ne.s32.totalorder %s17_s13, %s166_s21  ;;  %p172_p5 = scmp.lt.s32.totalorder %s166_s21, %s166_s21 }
   0xb   :  { %p173_p6 = por %p172_p5, %p171_p4 }
   0xd   :  { %p174_p7 = pnand %p173_p6, %p167_p3 }
   0xf   :  { %177 = shalt.err (!%p174_p7)
}
  0x10   :  { %s205_s22 = smov 128   ;;  %s206_s23 = smov 8  }
  0x11   :  { %22 = dma.hbm_to_vmem [thread:$0]  %s261_s0, 256, %s17_s13, [#allocation4], %s205_s22, %s205_s22, %s206_s23  }
  0x12   :  { %200 = dma.done.wait [#allocation4], 256  }
  0x13   :  { %201 = vsyncadd [#allocation4], 4294967040  ;;  %v207_v0 = vmov 0.0|0.0   ;;  %vm208_vm0 = vmmov 0   ;;  %v209_v1 = vmov 0.0   ;;  %v31_v2 = vld [vmem:[#allocation3] sm:$0xff]  ;;  %v34_v6 = vstv %s263_s2 }
  0x14   :  { %142 = vmatprep.subr.bf16.mxu0 %v207_v0  ;;  %139 = vmatprep.mubr.msk.f32.mxu0 %vm208_vm0, %v209_v1  ;;  %v32_v3 = vld [vmem:[#allocation3 + $0x8] sm:$0xff]  ;;  %v30_v5 = vld [vmem:[%s262_s1] sm:$0xf]  ;;  %s210_s0 = smov [#allocation6]   ;;  %vm115_vm1 = vcmask 125952  }
  0x15   :  { %v143_v4 = vpack.c.bf16 %v32_v3, %v31_v2  ;;  %s123_s30 = sshll.u32 %s210_s0, 4  ;;  %s124_s30 = int_to_ptr.vmem [resolvable:$true] %s123_s30 }
  0x16   :  { %s178_s1 = scalar_lea.vmem %s124_s30, 64  ;;  %p183_p9 = scmp.lt.s32.totalorder %s124_s30, %s124_s30 }
  0x17   :  { %144 = vmatpush3.bf16.xpose.msra.mxu0 %v143_v4  ;;  %p179_p8 = scmp.ne.s32.totalorder %s124_s30, %s178_s1  ;;  %p184_p10 = scmp.lt.s32.totalorder %s178_s1, %s178_s1 }
  0x19   :  { %p185_p11 = por %p184_p10, %p183_p9 }
  0x1b   :  { %p186_p12 = pnand %p185_p11, %p179_p8 }
  0x1e   :  { %140 = vmatmul.mubr.f32.vlgmr.msra.gmra.mrb[0].mxu0 %v30_v5 }
  0xf1   :  { %v101_v7 = vpop.f32.mrb[0].mxu0 }
  0xf2   :  { %v102_v8 = vadd.f32 %v101_v7, %v34_v6  ;;  %v141_v9 = vpop.f32.mrb[1].mxu0 }
  0xf4   :  { %v105_v10 = vand.u32 2147483647, %v102_v8  ;;  %vm109_vm2 = vcmp.ge.f32.partialorder %v102_v8, 0.0 }
  0xf6   :  { %v106_v11 = vsub.f32 0.0, %v105_v10 }
  0xf8   :  { %v107_v12 = vmul.f32 1.442695, %v106_v11 }
  0xfa   :  { %152 = vpow2.f32 %v107_v12 }
 0x104   :  { %v153_v13 = vpop.eup %152 }
 0x105   :  { %v110_v14 = vadd.f32 1.0, %v153_v13 }
 0x107   :  { %154 = vrcp.f32 %v110_v14 }
 0x111   :  { %v155_v15 = vpop.eup %154 }
 0x112   :  { %v113_v16 = vmul.f32 %v155_v15, %v153_v13 }
 0x114   :  { %v114_v17 = vsel %vm109_vm2, %v155_v15, %v113_v16 }
 0x115   :  { %116 = vst.msk [vmem:[#allocation6] sm:$0xf] %vm115_vm1, %v114_v17 }
 0x116   :  { %189 = shalt.err (!%p186_p12)
}
 0x117   :  { %s190_s5 = scalar_lea.hbm %s264_s3, 64 }
 0x118   :  { %p191_p13 = scmp.ne.s32.totalorder %s264_s3, %s190_s5  ;;  %p194_p0 = scmp.lt.u32.totalorder %s190_s5, %s264_s3 }
 0x11a   :  { %p196_p1 = pnand %p194_p0, %p191_p13 }
 0x11c   :  { %199 = shalt.err (!%p196_p1)
}
 0x11d   :  { %126 = dma.vmem_to_hbm [thread:$0]  %s124_s30, 64, %s264_s3, [#allocation5]  }
 0x11e   :  { %202 = dma.done.wait [#allocation5], 64  }
 0x11f   :  { %203 = vsyncadd [#allocation5], 4294967232 }
 0x120   :  { %130 = vsyncpa [#allocation4], 1 }
 0x121   :  { %131 = vsyncpa [#allocation5], 1 }

</bundles_post_ra>
